<compile_context>
chip_gen: v7x
topology: tpu7x:2x2x1
jax: 0.10.0
libtpu: 0.0.40
codegen_flags: <defaults>
</compile_context>

<pallas_src>
import functools

import jax
import jax.numpy as jnp
import numpy as np
from jax.experimental import pallas as pl
from jax.experimental.pallas import tpu as pltpu

IN_FEATURES = 8
HIDDEN = 64
NUM_ACTIONS = 6
NUM_OPTIONS = 4

# Fused-head column layout (lanes of the 4th matmul output / output row).
Q_OFF = 0
TERM_OFF = NUM_OPTIONS                       # 4
POL_OFF = 2 * NUM_OPTIONS                    # 8
POL_GROUP = 8                                # 6 real logits + 2 pad per option
POL_LANES = NUM_OPTIONS * POL_GROUP          # 32
ENT_OFF = POL_OFF + POL_LANES                # 40 (output row only)
OUT_LANES = 128                              # lane-dense output row
NEG_PAD = -1e30                              # finite: exp -> 0, 0*logp -> 0 (no NaN)

# Packed weights: rows 0..63 = W, row 64 = bias, rows 65..71 = zero pad.
BIAS_ROW = HIDDEN
W_ROWS = HIDDEN + 8                          # 72, sublane multiple of 8

EPS_MIN, EPS_START, DURATION = 0.1, 0.99, 50000.0


# ---------------------------------------------------------------------------
# Kernel
# ---------------------------------------------------------------------------
def _option_critic_kernel(x_ref, wb_ref, out_ref):
    # x_ref  : (BM, 64)  f32 observations zero-padded to HIDDEN lanes
    # wb_ref : (4, 72, 64) bf16 packed [W | bias | pad] per layer
    # out_ref: (BM, 128) f32 lane-dense result rows
    bm = x_ref.shape[0]

    # state_features MLP: 3 x (Linear + ReLU); one MXU push each, f32 accumulate.
    h = x_ref[...]                                                        # (BM, 64)
    for l in range(3):
        w = wb_ref[l, :HIDDEN, :].astype(jnp.float32)                     # (64, 64)
        b = wb_ref[l, BIAS_ROW:BIAS_ROW + 1, :].astype(jnp.float32)       # (1, 64)
        h = jnp.maximum(
            jnp.dot(h, w, preferred_element_type=jnp.float32) + b, 0.0)

    # Fused heads: [Q(4) | termination(4) | 4 x (6 logits + 2 pad) | zeros].
    w = wb_ref[3, :HIDDEN, :].astype(jnp.float32)
    b = wb_ref[3, BIAS_ROW:BIAS_ROW + 1, :].astype(jnp.float32)
    heads = jnp.dot(h, w, preferred_element_type=jnp.float32) + b         # (BM, 64)

    q = heads[:, Q_OFF:Q_OFF + NUM_OPTIONS]                               # (BM, 4)
    beta = jax.nn.sigmoid(heads[:, TERM_OFF:TERM_OFF + NUM_OPTIONS])      # (BM, 4)

    # Vectorized 4-option log-softmax + entropy over the 32-lane policy slab.
    pol = heads[:, POL_OFF:POL_OFF + POL_LANES]                           # (BM, 32)
    m = jnp.concatenate(
        [jnp.broadcast_to(
            jnp.max(pol[:, o * POL_GROUP:(o + 1) * POL_GROUP],
                    axis=-1, keepdims=True), (bm, POL_GROUP))
         for o in range(NUM_OPTIONS)], axis=-1)                           # (BM, 32)
    z = pol - m
    e = jnp.exp(z)                               # pad lanes (-1e30) underflow to 0
    s = jnp.concatenate(
        [jnp.broadcast_to(
            jnp.sum(e[:, o * POL_GROUP:(o + 1) * POL_GROUP],
                    axis=-1, keepdims=True), (bm, POL_GROUP))
         for o in range(NUM_OPTIONS)], axis=-1)                           # (BM, 32)
    logp = z - jnp.log(s)                        # pad lanes: huge-negative but finite
    plogp = (e / s) * logp                       # pad lanes: 0 * finite = 0 (no NaN)
    ent = jnp.concatenate(
        [-jnp.sum(plogp[:, o * POL_GROUP:(o + 1) * POL_GROUP],
                  axis=-1, keepdims=True)
         for o in range(NUM_OPTIONS)], axis=-1)                           # (BM, 4)

    lane = jax.lax.broadcasted_iota(jnp.int32, (bm, POL_LANES), 1)
    logp = jnp.where(lane % POL_GROUP < NUM_ACTIONS, logp, 0.0)           # zero pads

    # Single register-assembled, unmasked 128-lane store.
    pad = jnp.zeros((bm, OUT_LANES - (ENT_OFF + NUM_OPTIONS)), jnp.float32)
    out_ref[...] = jnp.concatenate([q, beta, logp, ent, pad], axis=-1)


# ---------------------------------------------------------------------------
# pallas_call wrapper (batched)
# ---------------------------------------------------------------------------
def _block_m(m):
    # Fill the MXU M dimension for large batches; one f32 sublane tile otherwise.
    for bm in (256, 128, 64, 32, 16):
        if m >= bm:
            return bm
    return 8


@jax.jit
def _network_core(states, wb_packed):
    m = states.shape[0]
    bm = _block_m(m)
    m_pad = ((m + bm - 1) // bm) * bm
    # Pad observations to (m_pad, HIDDEN); padded lanes/rows are zero and the
    # padded rows of the first weight slab are zero, so the matmul is exact.
    x = jnp.zeros((m_pad, HIDDEN), jnp.float32)
    x = x.at[:m, :IN_FEATURES].set(states.astype(jnp.float32))

    wb_bytes = int(wb_packed.size) * wb_packed.dtype.itemsize
    out = pl.pallas_call(
        _option_critic_kernel,
        out_shape=jax.ShapeDtypeStruct((m_pad, OUT_LANES), jnp.float32),
        grid=(m_pad // bm,),
        in_specs=[
            pl.BlockSpec((bm, HIDDEN), lambda i: (i, 0)),
            pl.BlockSpec((4, W_ROWS, HIDDEN), lambda i: (0, 0, 0)),
        ],
        out_specs=pl.BlockSpec((bm, OUT_LANES), lambda i: (i, 0)),
        compiler_params=pltpu.CompilerParams(
            dimension_semantics=("parallel",)),
        cost_estimate=pl.CostEstimate(
            flops=2 * 4 * HIDDEN * HIDDEN * m_pad,
            transcendentals=(POL_LANES + 2 * NUM_OPTIONS) * m_pad,
            bytes_accessed=wb_bytes + m_pad * HIDDEN * 4 + m_pad * OUT_LANES * 4),
    )(x, wb_packed)
    return out[:m]


# ---------------------------------------------------------------------------
# Parameter init / packing
# ---------------------------------------------------------------------------
def _init_linear(key, fan_in, fan_out):
    # PyTorch nn.Linear default init: U(-1/sqrt(fan_in), 1/sqrt(fan_in)).
    k_w, k_b = jax.random.split(key)
    bound = 1.0 / float(np.sqrt(fan_in))
    w = jax.random.uniform(k_w, (fan_in, fan_out), jnp.float32, -bound, bound)
    b = jax.random.uniform(k_b, (1, fan_out), jnp.float32, -bound, bound)
    return w, b


def init_params(key):
    keys = jax.random.split(key, 6)
    w1, b1 = _init_linear(keys[0], IN_FEATURES, HIDDEN)
    w2, b2 = _init_linear(keys[1], HIDDEN, HIDDEN)
    w3, b3 = _init_linear(keys[2], HIDDEN, HIDDEN)
    wq, bq = _init_linear(keys[3], HIDDEN, NUM_OPTIONS)
    wt, bt = _init_linear(keys[4], HIDDEN, NUM_OPTIONS)
    wp, bp = _init_linear(keys[5], HIDDEN, NUM_OPTIONS * NUM_ACTIONS)
    return (w1, b1, w2, b2, w3, b3, wq, bq, wt, bt, wp, bp)


def pack_params(raw):
    """Pack the 12 per-layer tensors into one bf16 (4, 72, 64) weight+bias array."""
    (w1, b1, w2, b2, w3, b3, wq, bq, wt, bt, wp, bp) = [
        np.asarray(t, np.float32) for t in raw]
    wb = np.zeros((4, W_ROWS, HIDDEN), np.float32)
    wb[0, :IN_FEATURES, :] = w1
    wb[0, BIAS_ROW, :] = b1[0]
    wb[1, :HIDDEN, :] = w2
    wb[1, BIAS_ROW, :] = b2[0]
    wb[2, :HIDDEN, :] = w3
    wb[2, BIAS_ROW, :] = b3[0]
    # Fused head: Q | termination | 4 x (6 policy logits + 2 pad lanes) | zeros.
    wb[3, :HIDDEN, Q_OFF:Q_OFF + NUM_OPTIONS] = wq
    wb[3, BIAS_ROW, Q_OFF:Q_OFF + NUM_OPTIONS] = bq[0]
    wb[3, :HIDDEN, TERM_OFF:TERM_OFF + NUM_OPTIONS] = wt
    wb[3, BIAS_ROW, TERM_OFF:TERM_OFF + NUM_OPTIONS] = bt[0]
    for o in range(NUM_OPTIONS):
        lo = POL_OFF + o * POL_GROUP
        wb[3, :HIDDEN, lo:lo + NUM_ACTIONS] = wp[:, o * NUM_ACTIONS:(o + 1) * NUM_ACTIONS]
        wb[3, BIAS_ROW, lo:lo + NUM_ACTIONS] = bp[0, o * NUM_ACTIONS:(o + 1) * NUM_ACTIONS]
        wb[3, BIAS_ROW, lo + NUM_ACTIONS:lo + POL_GROUP] = NEG_PAD  # finite pad bias
    return jax.device_put(jnp.asarray(wb, jnp.bfloat16))


# ---------------------------------------------------------------------------
# Forward pass (mirrors OptionCriticAgent.forward)
# ---------------------------------------------------------------------------
def network_outputs(states, wb_packed):
    """Kernel call; returns (Q, beta, log_pi, entropy) for one or many states."""
    states = jnp.asarray(states, jnp.float32)
    single = states.ndim == 1
    if single:
        states = states[None, :]
    out = _network_core(states, wb_packed)
    q = out[:, Q_OFF:Q_OFF + NUM_OPTIONS]
    beta = out[:, TERM_OFF:TERM_OFF + NUM_OPTIONS]
    logpi = out[:, POL_OFF:POL_OFF + POL_LANES].reshape(
        -1, NUM_OPTIONS, POL_GROUP)[:, :, :NUM_ACTIONS]
    ent = out[:, ENT_OFF:ENT_OFF + NUM_OPTIONS]
    if single:
        return q[0], beta[0], logpi[0], ent[0]
    return q, beta, logpi, ent


@jax.jit
def _forward_jit(state, wb_packed, current_option, num_steps, key):
    row = _network_core(state[None, :], wb_packed)[0]                 # (128,)
    q = row[Q_OFF:Q_OFF + NUM_OPTIONS]
    beta = row[TERM_OFF:TERM_OFF + NUM_OPTIONS]
    logpi = row[POL_OFF:POL_OFF + POL_LANES].reshape(
        NUM_OPTIONS, POL_GROUP)[:, :NUM_ACTIONS]
    ent = row[ENT_OFF:ENT_OFF + NUM_OPTIONS]

    # get_option: Bernoulli(beta_w) termination, epsilon-greedy option switch.
    beta_w = beta[current_option]
    k_term, k_eps, k_rand_opt, k_act = jax.random.split(key, 4)
    terminated = jax.random.bernoulli(k_term, beta_w)

    # eps property: num_steps increments before the comparison.  The branchless
    # max() is exactly the original schedule because the linear ramp reaches
    # eps_min exactly at num_steps == duration and keeps decreasing afterwards.
    steps = jnp.asarray(num_steps, jnp.float32) + 1.0
    eps = jnp.maximum(jnp.float32(EPS_MIN),
                      EPS_START + (EPS_MIN - EPS_START) / DURATION * steps)

    greedy_opt = jnp.argmax(q).astype(jnp.int32)
    rand_opt = jax.random.randint(k_rand_opt, (), 0, NUM_OPTIONS, dtype=jnp.int32)
    explore_draw = jax.random.uniform(k_eps)
    new_option = jnp.where(
        terminated,
        jnp.where(explore_draw > eps, greedy_opt, rand_opt),
        jnp.asarray(current_option, jnp.int32))

    # Policy of the (possibly new) option: Categorical sample / logprob / entropy.
    logpi_w = logpi[new_option]                                       # (A,)
    action = jax.random.categorical(k_act, logpi_w)
    logprob = logpi_w[action]
    entropy = ent[new_option]
    return action, beta_w, logprob, entropy, q[None, :], new_option


def forward(state_1d, wb_packed, current_option, num_steps, key):
    """Returns (action, beta_w, logprob, entropy, Q, new_option) in one dispatch."""
    # TODO(synk): the module's stateful np.random / self.num_steps /
    # self.current_option bookkeeping has no in-kernel equivalent; the caller
    # carries them and the Bernoulli / eps-greedy / Categorical sampling stays
    # in this jitted JAX epilogue (not in-kernel pltpu PRNG) so the RNG stream
    # remains reproducible and key-driven.
    state = jnp.asarray(state_1d, jnp.float32)
    return _forward_jit(state, wb_packed, jnp.int32(current_option),
                        jnp.int32(num_steps), key)


# ---------------------------------------------------------------------------
# Pure-JAX references (for sanity checks against the kernel)
# ---------------------------------------------------------------------------
def _reference(states, raw, precision=None):
    (w1, b1, w2, b2, w3, b3, wq, bq, wt, bt, wp, bp) = raw
    dot = functools.partial(jnp.dot, precision=precision,
                            preferred_element_type=jnp.float32)
    x = jnp.asarray(states, jnp.float32)
    h = jax.nn.relu(dot(x, w1) + b1)
    h = jax.nn.relu(dot(h, w2) + b2)
    h = jax.nn.relu(dot(h, w3) + b3)
    q = dot(h, wq) + bq
    beta = jax.nn.sigmoid(dot(h, wt) + bt)
    logits = (dot(h, wp) + bp).reshape(-1, NUM_OPTIONS, NUM_ACTIONS)
    logpi = jax.nn.log_softmax(logits, axis=-1)
    ent = -jnp.sum(jnp.exp(logpi) * logpi, axis=-1)
    return q, beta, logpi, ent


def _quantize_bf16(raw):
    return tuple(t.astype(jnp.bfloat16).astype(jnp.float32) for t in raw)


if __name__ == "__main__":
    root = jax.random.PRNGKey(0)
    k_params, k_state, k_fwd = jax.random.split(root, 3)

    raw_params = init_params(k_params)
    wb_packed = pack_params(raw_params)

    batch = 8                                   # one (8, 64) f32 sublane tile
    states = jax.random.normal(k_state, (batch, IN_FEATURES), jnp.float32)

    # Kernel vs a reference using the SAME bf16-rounded weights: both sides do
    # f32 math on identical parameters, so this is tight (slack only covers
    # MXU f32-emulation differences between Mosaic and XLA HIGHEST).
    qk, betak, logpik, entk = network_outputs(states, wb_packed)
    ref_q = _reference(states, _quantize_bf16(raw_params),
                       precision=jax.lax.Precision.HIGHEST)
    for got, want in zip((qk, betak, logpik, entk), ref_q):
        np.testing.assert_allclose(np.asarray(got), np.asarray(want),
                                   atol=2e-3, rtol=2e-3)

    # Looser check vs the raw f32 weights only bounds the bf16 weight-
    # quantization error (not a kernel-correctness check).
    ref_f = _reference(states, raw_params, precision=jax.lax.Precision.HIGHEST)
    for got, want in zip((qk, betak, logpik, entk), ref_f):
        np.testing.assert_allclose(np.asarray(got), np.asarray(want),
                                   atol=5e-2, rtol=5e-2)

    # Full forward pass on a single env observation (one jitted dispatch).
    current_option = 1  # deterministic stand-in for np.random.randint(num_options)
    action, beta_w, logprob, entropy, Q, new_option = forward(
        states[0], wb_packed, current_option, num_steps=0, key=k_fwd)
    jax.block_until_ready((action, beta_w, logprob, entropy, Q, new_option))
    print("KERNEL_OK")
</pallas_src>

<mosaic_0001>
module attributes {stable_mosaic.version = 11 : i64} {
  func.func @_option_critic_kernel(%arg0: i32, %arg1: memref<8x64xf32, #tpu.memory_space<vmem>>, %arg2: memref<4x72x64xbf16, #tpu.memory_space<vmem>>, %arg3: memref<8x128xf32, #tpu.memory_space<vmem>>) attributes {dimension_semantics = [#tpu.dimension_semantics<parallel>], iteration_bounds = array<i64: 1>, scalar_prefetch = 0 : i64, scratch_operands = 0 : i64, tpu.core_type = #tpu.core_type<tc>, window_params = [{transform_indices = @transform_0, window_bounds = array<i64: 8, 64>}, {pipeline_mode = #tpu.pipeline_mode<synchronous>, transform_indices = @transform_1, window_bounds = array<i64: 4, 72, 64>}, {transform_indices = @transform_2, window_bounds = array<i64: 8, 128>}]} {
    %c0 = arith.constant 0 : index
    %c0_0 = arith.constant 0 : index
    %0 = vector.load %arg1[%c0, %c0_0] : memref<8x64xf32, #tpu.memory_space<vmem>>, vector<8x64xf32>
    %c0_1 = arith.constant 0 : index
    %c0_2 = arith.constant 0 : index
    %c0_3 = arith.constant 0 : index
    %1 = vector.load %arg2[%c0_1, %c0_2, %c0_3] : memref<4x72x64xbf16, #tpu.memory_space<vmem>>, vector<1x64x64xbf16>
    %2 = vector.shape_cast %1 : vector<1x64x64xbf16> to vector<64x64xbf16>
    %3 = arith.extf %2 : vector<64x64xbf16> to vector<64x64xf32>
    %c0_4 = arith.constant 0 : index
    %c64 = arith.constant 64 : index
    %c0_5 = arith.constant 0 : index
    %4 = vector.load %arg2[%c0_4, %c64, %c0_5] : memref<4x72x64xbf16, #tpu.memory_space<vmem>>, vector<1x1x64xbf16>
    %5 = vector.shape_cast %4 : vector<1x1x64xbf16> to vector<1x64xbf16>
    %6 = arith.extf %5 : vector<1x64xbf16> to vector<1x64xf32>
    %cst = arith.constant dense<0.000000e+00> : vector<8x64xf32>
    %7 = tpu.matmul %0, %3, %cst {dimension_numbers = #tpu.dot_dimension_numbers<[1], [0], [0], [1], [0, 0, 1, 1], [], []>} : vector<8x64xf32>, vector<64x64xf32>, vector<8x64xf32> -> vector<8x64xf32>
    %8 = vector.broadcast %6 : vector<1x64xf32> to vector<8x64xf32>
    %9 = arith.addf %7, %8 : vector<8x64xf32>
    %cst_6 = arith.constant 0.000000e+00 : f32
    %10 = vector.broadcast %cst_6 : f32 to vector<8x64xf32>
    %11 = arith.maximumf %9, %10 : vector<8x64xf32>
    %c1 = arith.constant 1 : index
    %c0_7 = arith.constant 0 : index
    %c0_8 = arith.constant 0 : index
    %12 = vector.load %arg2[%c1, %c0_7, %c0_8] : memref<4x72x64xbf16, #tpu.memory_space<vmem>>, vector<1x64x64xbf16>
    %13 = vector.shape_cast %12 : vector<1x64x64xbf16> to vector<64x64xbf16>
    %14 = arith.extf %13 : vector<64x64xbf16> to vector<64x64xf32>
    %c1_9 = arith.constant 1 : index
    %c64_10 = arith.constant 64 : index
    %c0_11 = arith.constant 0 : index
    %15 = vector.load %arg2[%c1_9, %c64_10, %c0_11] : memref<4x72x64xbf16, #tpu.memory_space<vmem>>, vector<1x1x64xbf16>
    %16 = vector.shape_cast %15 : vector<1x1x64xbf16> to vector<1x64xbf16>
    %17 = arith.extf %16 : vector<1x64xbf16> to vector<1x64xf32>
    %cst_12 = arith.constant dense<0.000000e+00> : vector<8x64xf32>
    %18 = tpu.matmul %11, %14, %cst_12 {dimension_numbers = #tpu.dot_dimension_numbers<[1], [0], [0], [1], [0, 0, 1, 1], [], []>} : vector<8x64xf32>, vector<64x64xf32>, vector<8x64xf32> -> vector<8x64xf32>
    %19 = vector.broadcast %17 : vector<1x64xf32> to vector<8x64xf32>
    %20 = arith.addf %18, %19 : vector<8x64xf32>
    %cst_13 = arith.constant 0.000000e+00 : f32
    %21 = vector.broadcast %cst_13 : f32 to vector<8x64xf32>
    %22 = arith.maximumf %20, %21 : vector<8x64xf32>
    %c2 = arith.constant 2 : index
    %c0_14 = arith.constant 0 : index
    %c0_15 = arith.constant 0 : index
    %23 = vector.load %arg2[%c2, %c0_14, %c0_15] : memref<4x72x64xbf16, #tpu.memory_space<vmem>>, vector<1x64x64xbf16>
    %24 = vector.shape_cast %23 : vector<1x64x64xbf16> to vector<64x64xbf16>
    %25 = arith.extf %24 : vector<64x64xbf16> to vector<64x64xf32>
    %c2_16 = arith.constant 2 : index
    %c64_17 = arith.constant 64 : index
    %c0_18 = arith.constant 0 : index
    %26 = vector.load %arg2[%c2_16, %c64_17, %c0_18] : memref<4x72x64xbf16, #tpu.memory_space<vmem>>, vector<1x1x64xbf16>
    %27 = vector.shape_cast %26 : vector<1x1x64xbf16> to vector<1x64xbf16>
    %28 = arith.extf %27 : vector<1x64xbf16> to vector<1x64xf32>
    %cst_19 = arith.constant dense<0.000000e+00> : vector<8x64xf32>
    %29 = tpu.matmul %22, %25, %cst_19 {dimension_numbers = #tpu.dot_dimension_numbers<[1], [0], [0], [1], [0, 0, 1, 1], [], []>} : vector<8x64xf32>, vector<64x64xf32>, vector<8x64xf32> -> vector<8x64xf32>
    %30 = vector.broadcast %28 : vector<1x64xf32> to vector<8x64xf32>
    %31 = arith.addf %29, %30 : vector<8x64xf32>
    %cst_20 = arith.constant 0.000000e+00 : f32
    %32 = vector.broadcast %cst_20 : f32 to vector<8x64xf32>
    %33 = arith.maximumf %31, %32 : vector<8x64xf32>
    %c3 = arith.constant 3 : index
    %c0_21 = arith.constant 0 : index
    %c0_22 = arith.constant 0 : index
    %34 = vector.load %arg2[%c3, %c0_21, %c0_22] : memref<4x72x64xbf16, #tpu.memory_space<vmem>>, vector<1x64x64xbf16>
    %35 = vector.shape_cast %34 : vector<1x64x64xbf16> to vector<64x64xbf16>
    %36 = arith.extf %35 : vector<64x64xbf16> to vector<64x64xf32>
    %c3_23 = arith.constant 3 : index
    %c64_24 = arith.constant 64 : index
    %c0_25 = arith.constant 0 : index
    %37 = vector.load %arg2[%c3_23, %c64_24, %c0_25] : memref<4x72x64xbf16, #tpu.memory_space<vmem>>, vector<1x1x64xbf16>
    %38 = vector.shape_cast %37 : vector<1x1x64xbf16> to vector<1x64xbf16>
    %39 = arith.extf %38 : vector<1x64xbf16> to vector<1x64xf32>
    %cst_26 = arith.constant dense<0.000000e+00> : vector<8x64xf32>
    %40 = tpu.matmul %33, %36, %cst_26 {dimension_numbers = #tpu.dot_dimension_numbers<[1], [0], [0], [1], [0, 0, 1, 1], [], []>} : vector<8x64xf32>, vector<64x64xf32>, vector<8x64xf32> -> vector<8x64xf32>
    %41 = vector.broadcast %39 : vector<1x64xf32> to vector<8x64xf32>
    %42 = arith.addf %40, %41 : vector<8x64xf32>
    %43 = vector.extract_strided_slice %42 {offsets = [0, 0], sizes = [8, 4], strides = [1, 1]} : vector<8x64xf32> to vector<8x4xf32>
    %44 = vector.extract_strided_slice %42 {offsets = [0, 4], sizes = [8, 4], strides = [1, 1]} : vector<8x64xf32> to vector<8x4xf32>
    %45 = arith.negf %44 : vector<8x4xf32>
    %46 = math.exp %45 : vector<8x4xf32>
    %cst_27 = arith.constant 1.000000e+00 : f32
    %47 = vector.broadcast %cst_27 : f32 to vector<8x4xf32>
    %48 = arith.addf %47, %46 : vector<8x4xf32>
    %49 = arith.divf %47, %48 : vector<8x4xf32>
    %50 = vector.extract_strided_slice %42 {offsets = [0, 8], sizes = [8, 32], strides = [1, 1]} : vector<8x64xf32> to vector<8x32xf32>
    %51 = vector.extract_strided_slice %50 {offsets = [0, 0], sizes = [8, 8], strides = [1, 1]} : vector<8x32xf32> to vector<8x8xf32>
    %cst_28 = arith.constant dense<0xFF800000> : vector<8xf32>
    %52 = vector.multi_reduction <maximumf>, %51, %cst_28 [1] : vector<8x8xf32> to vector<8xf32>
    %53 = vector.shape_cast %52 : vector<8xf32> to vector<8x1xf32>
    %54 = vector.shape_cast %53 : vector<8x1xf32> to vector<8x1xf32>
    %55 = vector.broadcast %54 : vector<8x1xf32> to vector<8x8xf32>
    %56 = vector.extract_strided_slice %50 {offsets = [0, 8], sizes = [8, 8], strides = [1, 1]} : vector<8x32xf32> to vector<8x8xf32>
    %cst_29 = arith.constant dense<0xFF800000> : vector<8xf32>
    %57 = vector.multi_reduction <maximumf>, %56, %cst_29 [1] : vector<8x8xf32> to vector<8xf32>
    %58 = vector.shape_cast %57 : vector<8xf32> to vector<8x1xf32>
    %59 = vector.shape_cast %58 : vector<8x1xf32> to vector<8x1xf32>
    %60 = vector.broadcast %59 : vector<8x1xf32> to vector<8x8xf32>
    %61 = vector.extract_strided_slice %50 {offsets = [0, 16], sizes = [8, 8], strides = [1, 1]} : vector<8x32xf32> to vector<8x8xf32>
    %cst_30 = arith.constant dense<0xFF800000> : vector<8xf32>
    %62 = vector.multi_reduction <maximumf>, %61, %cst_30 [1] : vector<8x8xf32> to vector<8xf32>
    %63 = vector.shape_cast %62 : vector<8xf32> to vector<8x1xf32>
    %64 = vector.shape_cast %63 : vector<8x1xf32> to vector<8x1xf32>
    %65 = vector.broadcast %64 : vector<8x1xf32> to vector<8x8xf32>
    %66 = vector.extract_strided_slice %50 {offsets = [0, 24], sizes = [8, 8], strides = [1, 1]} : vector<8x32xf32> to vector<8x8xf32>
    %cst_31 = arith.constant dense<0xFF800000> : vector<8xf32>
    %67 = vector.multi_reduction <maximumf>, %66, %cst_31 [1] : vector<8x8xf32> to vector<8xf32>
    %68 = vector.shape_cast %67 : vector<8xf32> to vector<8x1xf32>
    %69 = vector.shape_cast %68 : vector<8x1xf32> to vector<8x1xf32>
    %70 = vector.broadcast %69 : vector<8x1xf32> to vector<8x8xf32>
    %71 = tpu.concatenate %55, %60, %65, %70 in 1 : vector<8x8xf32>, vector<8x8xf32>, vector<8x8xf32>, vector<8x8xf32> -> vector<8x32xf32>
    %72 = arith.subf %50, %71 : vector<8x32xf32>
    %73 = math.exp %72 : vector<8x32xf32>
    %74 = vector.extract_strided_slice %73 {offsets = [0, 0], sizes = [8, 8], strides = [1, 1]} : vector<8x32xf32> to vector<8x8xf32>
    %cst_32 = arith.constant dense<0.000000e+00> : vector<8xf32>
    %75 = vector.multi_reduction <add>, %74, %cst_32 [1] : vector<8x8xf32> to vector<8xf32>
    %76 = vector.shape_cast %75 : vector<8xf32> to vector<8x1xf32>
    %77 = vector.shape_cast %76 : vector<8x1xf32> to vector<8x1xf32>
    %78 = vector.broadcast %77 : vector<8x1xf32> to vector<8x8xf32>
    %79 = vector.extract_strided_slice %73 {offsets = [0, 8], sizes = [8, 8], strides = [1, 1]} : vector<8x32xf32> to vector<8x8xf32>
    %cst_33 = arith.constant dense<0.000000e+00> : vector<8xf32>
    %80 = vector.multi_reduction <add>, %79, %cst_33 [1] : vector<8x8xf32> to vector<8xf32>
    %81 = vector.shape_cast %80 : vector<8xf32> to vector<8x1xf32>
    %82 = vector.shape_cast %81 : vector<8x1xf32> to vector<8x1xf32>
    %83 = vector.broadcast %82 : vector<8x1xf32> to vector<8x8xf32>
    %84 = vector.extract_strided_slice %73 {offsets = [0, 16], sizes = [8, 8], strides = [1, 1]} : vector<8x32xf32> to vector<8x8xf32>
    %cst_34 = arith.constant dense<0.000000e+00> : vector<8xf32>
    %85 = vector.multi_reduction <add>, %84, %cst_34 [1] : vector<8x8xf32> to vector<8xf32>
    %86 = vector.shape_cast %85 : vector<8xf32> to vector<8x1xf32>
    %87 = vector.shape_cast %86 : vector<8x1xf32> to vector<8x1xf32>
    %88 = vector.broadcast %87 : vector<8x1xf32> to vector<8x8xf32>
    %89 = vector.extract_strided_slice %73 {offsets = [0, 24], sizes = [8, 8], strides = [1, 1]} : vector<8x32xf32> to vector<8x8xf32>
    %cst_35 = arith.constant dense<0.000000e+00> : vector<8xf32>
    %90 = vector.multi_reduction <add>, %89, %cst_35 [1] : vector<8x8xf32> to vector<8xf32>
    %91 = vector.shape_cast %90 : vector<8xf32> to vector<8x1xf32>
    %92 = vector.shape_cast %91 : vector<8x1xf32> to vector<8x1xf32>
    %93 = vector.broadcast %92 : vector<8x1xf32> to vector<8x8xf32>
    %94 = tpu.concatenate %78, %83, %88, %93 in 1 : vector<8x8xf32>, vector<8x8xf32>, vector<8x8xf32>, vector<8x8xf32> -> vector<8x32xf32>
    %95 = math.log %94 : vector<8x32xf32>
    %96 = arith.subf %72, %95 : vector<8x32xf32>
    %97 = arith.divf %73, %94 : vector<8x32xf32>
    %98 = arith.mulf %97, %96 : vector<8x32xf32>
    %99 = vector.extract_strided_slice %98 {offsets = [0, 0], sizes = [8, 8], strides = [1, 1]} : vector<8x32xf32> to vector<8x8xf32>
    %cst_36 = arith.constant dense<0.000000e+00> : vector<8xf32>
    %100 = vector.multi_reduction <add>, %99, %cst_36 [1] : vector<8x8xf32> to vector<8xf32>
    %101 = vector.shape_cast %100 : vector<8xf32> to vector<8x1xf32>
    %cst_37 = arith.constant 0.000000e+00 : f32
    %102 = vector.broadcast %cst_37 : f32 to vector<8x1xf32>
    %103 = arith.subf %102, %101 : vector<8x1xf32>
    %104 = vector.extract_strided_slice %98 {offsets = [0, 8], sizes = [8, 8], strides = [1, 1]} : vector<8x32xf32> to vector<8x8xf32>
    %cst_38 = arith.constant dense<0.000000e+00> : vector<8xf32>
    %105 = vector.multi_reduction <add>, %104, %cst_38 [1] : vector<8x8xf32> to vector<8xf32>
    %106 = vector.shape_cast %105 : vector<8xf32> to vector<8x1xf32>
    %cst_39 = arith.constant 0.000000e+00 : f32
    %107 = vector.broadcast %cst_39 : f32 to vector<8x1xf32>
    %108 = arith.subf %107, %106 : vector<8x1xf32>
    %109 = vector.extract_strided_slice %98 {offsets = [0, 16], sizes = [8, 8], strides = [1, 1]} : vector<8x32xf32> to vector<8x8xf32>
    %cst_40 = arith.constant dense<0.000000e+00> : vector<8xf32>
    %110 = vector.multi_reduction <add>, %109, %cst_40 [1] : vector<8x8xf32> to vector<8xf32>
    %111 = vector.shape_cast %110 : vector<8xf32> to vector<8x1xf32>
    %cst_41 = arith.constant 0.000000e+00 : f32
    %112 = vector.broadcast %cst_41 : f32 to vector<8x1xf32>
    %113 = arith.subf %112, %111 : vector<8x1xf32>
    %114 = vector.extract_strided_slice %98 {offsets = [0, 24], sizes = [8, 8], strides = [1, 1]} : vector<8x32xf32> to vector<8x8xf32>
    %cst_42 = arith.constant dense<0.000000e+00> : vector<8xf32>
    %115 = vector.multi_reduction <add>, %114, %cst_42 [1] : vector<8x8xf32> to vector<8xf32>
    %116 = vector.shape_cast %115 : vector<8xf32> to vector<8x1xf32>
    %cst_43 = arith.constant 0.000000e+00 : f32
    %117 = vector.broadcast %cst_43 : f32 to vector<8x1xf32>
    %118 = arith.subf %117, %116 : vector<8x1xf32>
    %119 = tpu.concatenate %103, %108, %113, %118 in 1 : vector<8x1xf32>, vector<8x1xf32>, vector<8x1xf32>, vector<8x1xf32> -> vector<8x4xf32>
    %120 = tpu.iota {dimensions = array<i32: 1>} : vector<8x32xi32>
    %c8_i32 = arith.constant 8 : i32
    %c0_i32 = arith.constant 0 : i32
    %121 = arith.cmpi eq, %c8_i32, %c0_i32 : i32
    %c1_i32 = arith.constant 1 : i32
    %122 = arith.select %121, %c1_i32, %c8_i32 : i32
    %123 = vector.broadcast %122 : i32 to vector<8x32xi32>
    %124 = arith.remsi %120, %123 : vector<8x32xi32>
    %c0_i32_44 = arith.constant 0 : i32
    %125 = vector.broadcast %c0_i32_44 : i32 to vector<8x32xi32>
    %126 = arith.cmpi ne, %124, %125 : vector<8x32xi32>
    %c0_i32_45 = arith.constant 0 : i32
    %127 = vector.broadcast %c0_i32_45 : i32 to vector<8x32xi32>
    %128 = arith.cmpi slt, %124, %127 : vector<8x32xi32>
    %c0_i32_46 = arith.constant 0 : i32
    %129 = arith.cmpi slt, %122, %c0_i32_46 : i32
    %130 = vector.broadcast %129 : i1 to vector<8x32xi1>
    %131 = vector.broadcast %130 : vector<8x32xi1> to vector<8x32xi1>
    %132 = arith.xori %128, %131 : vector<8x32xi1>
    %133 = arith.andi %132, %126 : vector<8x32xi1>
    %134 = vector.broadcast %122 : i32 to vector<8x32xi32>
    %135 = arith.addi %124, %134 : vector<8x32xi32>
    %136 = arith.select %133, %135, %124 : vector<8x32xi1>, vector<8x32xi32>
    %c6_i32 = arith.constant 6 : i32
    %137 = vector.broadcast %c6_i32 : i32 to vector<8x32xi32>
    %138 = arith.cmpi slt, %136, %137 : vector<8x32xi32>
    %cst_47 = arith.constant 0.000000e+00 : f32
    %139 = vector.broadcast %cst_47 : f32 to vector<8x32xf32>
    %140 = arith.select %138, %96, %139 : vector<8x32xi1>, vector<8x32xf32>
    %cst_48 = arith.constant 0.000000e+00 : f32
    %141 = vector.broadcast %cst_48 : f32 to vector<8x84xf32>
    %142 = tpu.concatenate %43, %49, %140, %119, %141 in 1 : vector<8x4xf32>, vector<8x4xf32>, vector<8x32xf32>, vector<8x4xf32>, vector<8x84xf32> -> vector<8x128xf32>
    %c0_49 = arith.constant 0 : index
    %c0_50 = arith.constant 0 : index
    %143 = vector.load %arg3[%c0_49, %c0_50] : memref<8x128xf32, #tpu.memory_space<vmem>>, vector<8x128xf32>
    tpu.vector_store %arg3[%c0_49, %c0_50], %142 {strides = array<i32>} : memref<8x128xf32, #tpu.memory_space<vmem>>, vector<8x128xf32>,
    return
  }
  func.func @transform_0(%arg0: i32) -> (i32, i32) {
    %c0_i32 = arith.constant 0 : i32
    %c0_i32_0 = arith.constant 0 : i32
    return %arg0, %c0_i32 : i32, i32
  }
  func.func @transform_1(%arg0: i32) -> (i32, i32, i32) {
    %c0_i32 = arith.constant 0 : i32
    %c0_i32_0 = arith.constant 0 : i32
    %c0_i32_1 = arith.constant 0 : i32
    %c0_i32_2 = arith.constant 0 : i32
    return %c0_i32, %c0_i32_0, %c0_i32_1 : i32, i32, i32
  }
  func.func @transform_2(%arg0: i32) -> (i32, i32) {
    %c0_i32 = arith.constant 0 : i32
    %c0_i32_0 = arith.constant 0 : i32
    return %arg0, %c0_i32 : i32, i32
  }
}

</mosaic_0001>

<bundles_post_ra>
// kernel: _network_core.1
= control target key start
LH: loop header
LB: loop body
LE: loop exit
PB: predicated region body
PF: predicated region fallthrough
CT: control target
= control target key end

     0   :  { %v913_v1 = vmov 0.0|0.0   ;;  %vm914_vm0 = vmmov 0   ;;  %v915_v2 = vmov 0.0   ;;  %s1076_s0 = inlined_call_operand.vmem [shape: f32[8,64], index: 0, kind: input, shape index: {}]   ;;  %s1077_s1 = inlined_call_operand.vmem [shape: bf16[4,72,64], index: 1, kind: input, shape index: {}]   ;;  %s1078_s2 = inlined_call_operand.hbm [shape: f32[8,128], index: 2, kind: output, shape index: {}]  }
   0x1   :  { %v595_v0 = vld [vmem:[%s1077_s1] sm:$0xff]   ;;  %775 = vmatprep.subr.bf16.mxu0 %v913_v1  ;;  %715 = vmatprep.mubr.msk.f32.mxu0 %vm914_vm0, %v915_v2  ;;  %v650_v4 = vld [vmem:[%s1077_s1 + $0x8] sm:$0xff]  }
   0x2   :  { %777 = vmatpush3.bf16.msra.mxu0 %v595_v0  ;;  %787 = vmatprep.subr.bf16.mxu1 %v913_v1  ;;  %v877_v3 = vld [vmem:[%s1077_s1 + $0x24] sm:$0xff]   ;;  %v857_v5 = vld [vmem:[%s1077_s1 + $0x2c] sm:$0xff]  }
   0x3   :  { %778 = vmatprep.subr.bf16.mxu0 %v913_v1  ;;  %734 = vmatprep.mubr.msk.f32.mxu1 %vm914_vm0, %v915_v2 }
   0x4   :  { %789 = vmatpush3.bf16.msra.mxu1 %v877_v3 }
   0x5   :  { %7 = vsyncpa [#allocation3], 0  ;;  %790 = vmatprep.subr.bf16.mxu1 %v913_v1  ;;  %v651_v6 = vld [vmem:[%s1077_s1 + $0x10] sm:$0xff]   ;;  %v652_v8 = vld [vmem:[%s1077_s1 + $0x18] sm:$0xff]   ;;  %vm35_vm1 = vcmask 523264   ;;  %v31_v14 = vlaneseq  ;;  %vm414_vm2 = vcmask 261312  }
   0x6   :  { %780 = vmatpush3.bf16.msra.mxu0 %v650_v4  ;;  %v859_v7 = vld [vmem:[%s1077_s1 + $0x34] sm:$0xff]   ;;  %v12_v9 = vld [vmem:[%s1076_s0] sm:$0xff]  ;;  %v656_v11 = vld [vmem:[%s1077_s1 + $0x48] sm:$0xff]   ;;  %vm406_vm3 = vcmask 130112   ;;  %vm418_vm4 = vcmask 326912   ;;  %vm410_vm5 = vcmask 195712  }
   0x7   :  { %781 = vmatprep.subr.bf16.mxu0 %v913_v1  ;;  %v860_v10 = vld [vmem:[%s1077_s1 + $0x3c] sm:$0xff]  ;;  %v657_v12 = vld [vmem:[%s1077_s1 + $0x50] sm:$0xff]   ;;  %v32_v15 = vshrl.u32 %v31_v14, 7  ;;  %v571_v28 = vld [vmem:[%s1077_s1 + $0x44] sm:$0x1]  ;;  %vm422_vm6 = vcmask 64512  }
   0x8   :  { %792 = vmatpush3.bf16.msra.mxu1 %v857_v5  ;;  %v658_v13 = vld [vmem:[%s1077_s1 + $0x58] sm:$0xff]   ;;  %v29_v16 = vld [vmem:[%s1077_s1 + $0x20] sm:$0x1]  ;;  %v878_v25 = vld [vmem:[%s1077_s1 + $0x6c] sm:$0xff]   ;;  %v128_v29 = vunpack.c.l.bf16 %v571_v28  ;;  %vm424_vm7 = vcmask 130048   ;;  %vm426_vm8 = vcmask 195584  }
   0x9   :  { %793 = vmatprep.subr.bf16.mxu1 %v913_v1  ;;  %v30_v17 = vunpack.c.l.bf16 %v29_v16  ;;  %v33_v18 = vsub.s32 0, %v32_v15  ;;  %v659_v24 = vld [vmem:[%s1077_s1 + $0x60] sm:$0xff]   ;;  %v863_v26 = vld [vmem:[%s1077_s1 + $0x74] sm:$0xff]   ;;  %v581_v36 = vld [vmem:[%s1077_s1 + $0x68] sm:$0x1]  ;;  %s917_s22 = smov 96  }
   0xa   :  { %783 = vmatpush3.bf16.msra.mxu0 %v651_v6  ;;  %v865_v27 = vld [vmem:[%s1077_s1 + $0x7c] sm:$0xff]   ;;  %v866_v35 = vld [vmem:[%s1077_s1 + $0x84] sm:$0xff]  ;;  %v225_v37 = vunpack.c.l.bf16 %v581_v36  ;;  %v591_v43 = vld [vmem:[%s1077_s1 + $0x8c] sm:$0x1]  ;;  %s916_s1 = smov 8   ;;  %s918_s23 = smov 120  }
   0xb   :  { %784 = vmatprep.subr.bf16.mxu0 %v913_v1  ;;  %v34_v19 = vrot.slane %v30_v17, %v33_v18  ;;  %v132_v30 = vrot.slane %v128_v29, %v33_v18  ;;  %v322_v44 = vunpack.c.l.bf16 %v591_v43  ;;  %s919_s24 = smov 112   ;;  %s920_s25 = smov 104   ;;  %vm506_vm10 = vcmask 7168  }
   0xc   :  { %795 = vmatpush3.bf16.msra.mxu1 %v859_v7  ;;  %v229_v38 = vrot.slane %v225_v37, %v33_v18  ;;  %vm508_vm11 = vcmask 15360   ;;  %vm510_vm12 = vcmask 23552   ;;  %s921_s26 = smov 40   ;;  %vm540_vm13 = vcmask 31744   ;;  %s922_s27 = smov [#allocation2]  }
   0xd   :  { %796 = vmatprep.subr.bf16.mxu1 %v913_v1  ;;  %v326_v45 = vrot.slane %v322_v44, %v33_v18  ;;  %vm543_vm14 = vcmask 326656   ;;  %s554_s28 = sshll.u32 %s922_s27, 4  ;;  %vm545_vm15 = vcmask 359424   ;;  %s555_s28 = int_to_ptr.vmem [resolvable:$true] %s554_s28 }
   0xe   :  { %786 = vmatpush3.bf16.msra.mxu0 %v652_v8  ;;  %s889_s0 = scalar_lea.vmem %s555_s28, 128  ;;  %p894_p1 = scmp.lt.s32.totalorder %s555_s28, %s555_s28 }
   0xf   :  { %799 = vmatprep.subr.bf16.mxu0 %v913_v1  ;;  %p890_p0 = scmp.ne.s32.totalorder %s555_s28, %s889_s0  ;;  %p895_p2 = scmp.lt.s32.totalorder %s889_s0, %s889_s0 }
  0x10   :  { %798 = vmatpush3.bf16.msra.mxu1 %v860_v10 }
  0x11   :  { %716 = vmatmul.mubr.msk.f32.vlgmr.msra.gmra.mrb[0].mxu0 %vm35_vm1, %v12_v9  ;;  %811 = vmatprep.subr.bf16.mxu1 %v913_v1  ;;  %p896_p3 = por %p895_p2, %p894_p1 }
  0x12   :  { %753 = vmatprep.mubr.msk.f32.mxu0 %vm914_vm0, %v915_v2  ;;  %801 = vmatpush3.bf16.msra.mxu0 %v656_v11 }
  0x13   :  { %802 = vmatprep.subr.bf16.mxu0 %v913_v1  ;;  %p897_p4 = pnand %p896_p3, %p890_p0 }
  0x16   :  { %804 = vmatpush3.bf16.msra.mxu0 %v657_v12 }
  0x17   :  { %805 = vmatprep.subr.bf16.mxu0 %v913_v1 }
  0x1a   :  { %807 = vmatpush3.bf16.msra.mxu0 %v658_v13 }
  0x1b   :  { %808 = vmatprep.subr.bf16.mxu0 %v913_v1 }
  0x1e   :  { %810 = vmatpush3.bf16.msra.mxu0 %v659_v24 }
  0xe4   :  { %v105_v20 = vpop.f32.mrb[0].mxu0 }
  0xe5   :  { %v106_v21 = vadd.f32 %v105_v20, %v34_v19  ;;  %v717_v22 = vpop.f32.mrb[1].mxu0 }
  0xe7   :  { %v109_v23 = vmax.f32 %v106_v21, 0.0 }
  0xe9   :  { %735 = vmatmul.mubr.msk.f32.vlgmr.msra.gmra.mrb[0].mxu1 %vm35_vm1, %v109_v23 }
  0xea   :  { %772 = vmatprep.mubr.msk.f32.mxu1 %vm914_vm0, %v915_v2  ;;  %813 = vmatpush3.bf16.msra.mxu1 %v878_v25 }
  0xeb   :  { %814 = vmatprep.subr.bf16.mxu1 %v913_v1 }
  0xee   :  { %816 = vmatpush3.bf16.msra.mxu1 %v863_v26 }
  0xef   :  { %817 = vmatprep.subr.bf16.mxu1 %v913_v1 }
  0xf2   :  { %819 = vmatpush3.bf16.msra.mxu1 %v865_v27 }
  0xf3   :  { %820 = vmatprep.subr.bf16.mxu1 %v913_v1 }
  0xf6   :  { %822 = vmatpush3.bf16.msra.mxu1 %v866_v35 }
 0x1bc   :  { %v202_v31 = vpop.f32.mrb[0].mxu1 }
 0x1bd   :  { %v203_v32 = vadd.f32 %v202_v31, %v132_v30  ;;  %v736_v33 = vpop.f32.mrb[1].mxu1 }
 0x1bf   :  { %v206_v34 = vmax.f32 %v203_v32, 0.0  ;;  %v513_v32 = vand.u32 127, %v31_v14 }
 0x1c1   :  { %754 = vmatmul.mubr.msk.f32.vlgmr.msra.gmra.mrb[2].mxu0 %vm35_vm1, %v206_v34  ;;  %v518_v33 = vand.u32 7, %v513_v32 }
 0x1c3   :  { %vm526_vm9 = vcmp.lt.s32.totalorder %v518_v33, 6 }
 0x294   :  { %v299_v39 = vpop.f32.mrb[2].mxu0 }
 0x295   :  { %v300_v40 = vadd.f32 %v299_v39, %v229_v38  ;;  %v755_v41 = vpop.f32.mrb[3].mxu0 }
 0x297   :  { %v303_v42 = vmax.f32 %v300_v40, 0.0 }
 0x299   :  { %773 = vmatmul.mubr.msk.f32.vlgmr.msra.gmra.mrb[2].mxu1 %vm35_vm1, %v303_v42 }
 0x36c   :  { %v396_v46 = vpop.f32.mrb[2].mxu1 }
 0x36d   :  { %v1026_v47 = vadd.f32 %v396_v46, %v326_v45  ;;  %v774_v48 = vpop.f32.mrb[3].mxu1 }
 0x36f   :  { %v415_v49 = vsel %vm414_vm2, %v1026_v47, -inf  ;;  %v407_v50 = vsel %vm406_vm3, %v1026_v47, -inf  ;;  %v419_v51 = vsel %vm418_vm4, %v1026_v47, -inf  ;;  %v411_v52 = vsel %vm410_vm5, %v1026_v47, -inf }
 0x370   :  { %416 = vmax.xlane.f32.xlu1 %v415_v49  ;;  %408 = vmax.xlane.f32.xlu0 %v407_v50  ;;  %v593_v46 = vmul.f32 -1.442695, %v1026_v47 }
 0x374   :  { %420 = vmax.xlane.f32.xlu1 %v419_v51  ;;  %412 = vmax.xlane.f32.xlu0 %v411_v52 }
 0x3fd   :  { %v417_v53 = vpop.xlane.xlu1 %416  ;;  %v409_v54 = vpop.xlane.xlu0 %408 }
 0x401   :  { %v413_v55 = vpop.xlane.xlu0 %412  ;;  %v421_v57 = vpop.xlane.xlu1 %420 }
 0x402   :  { %v423_v56 = vsel %vm422_vm6, %v409_v54, %v413_v55 }
 0x403   :  { %v425_v58 = vsel %vm424_vm7, %v423_v56, %v417_v53 }
 0x404   :  { %v427_v59 = vsel %vm426_vm8, %v425_v58, %v421_v57 }
 0x405   :  { %429 = vrot.lane.b32.xlu0 %v427_v59, %s916_s1 }
 0x477   :  { %v430_v60 = vpop.permute.xlu0 %429 }
 0x478   :  { %v432_v61 = vsub.f32 %v1026_v47, %v430_v60 }
 0x47a   :  { %v433_v62 = vmul.f32 1.442695, %v432_v61 }
 0x47c   :  { %879 = vpow2.f32 %v433_v62 }
 0x486   :  { %v880_v63 = vpop.eup %879 }
 0x487   :  { %454 = vrot.lane.b32.xlu0 %v880_v63, %s917_s22  ;;  %436 = vrot.lane.b32.xlu1 %v880_v63, %s918_s23 }
 0x48b   :  { %442 = vrot.lane.b32.xlu1 %v880_v63, %s919_s24 }
 0x48f   :  { %448 = vrot.lane.b32.xlu1 %v880_v63, %s920_s25 }
 0x4f9   :  { %v437_v0 = vpop.permute.xlu1 %436  ;;  %v455_v6 = vpop.permute.xlu0 %454 }
 0x4fa   :  { %v439_v1 = vsel %vm422_vm6, %v437_v0, 0.0  ;;  %v457_v7 = vsel %vm422_vm6, %v455_v6, 0.0 }
 0x4fb   :  { %440 = vadd.xlane.f32.xlu1 %v439_v1 }
 0x4fd   :  { %v443_v2 = vpop.permute.xlu1 %442 }
 0x4fe   :  { %v445_v3 = vsel %vm422_vm6, %v443_v2, 0.0 }
 0x4ff   :  { %446 = vadd.xlane.f32.xlu0 %v445_v3 }
 0x501   :  { %v449_v4 = vpop.permute.xlu1 %448 }
 0x502   :  { %v451_v5 = vsel %vm422_vm6, %v449_v4, 0.0 }
 0x503   :  { %452 = vadd.xlane.f32.xlu0 %v451_v5 }
 0x507   :  { %458 = vadd.xlane.f32.xlu0 %v457_v7 }
 0x588   :  { %v441_v10 = vpop.xlane.xlu1 %440 }
 0x58c   :  { %v447_v8 = vpop.xlane.xlu0 %446 }
 0x58d   :  { %v460_v11 = vsel %vm422_vm6, %v441_v10, %v447_v8 }
 0x590   :  { %v453_v9 = vpop.xlane.xlu0 %452 }
 0x591   :  { %v461_v12 = vsel %vm424_vm7, %v460_v11, %v453_v9 }
 0x594   :  { %v459_v13 = vpop.xlane.xlu0 %458 }
 0x595   :  { %v462_v15 = vsel %vm426_vm8, %v461_v12, %v459_v13 }
 0x596   :  { %471 = vrot.lane.b32.xlu1 %v462_v15, %s916_s1  ;;  %881 = vlog2.f32 %v462_v15 }
 0x5a0   :  { %v882_v16 = vpop.eup %881 }
 0x5a1   :  { %v464_v17 = vmul.f32 0.6931472, %v882_v16 }
 0x5a3   :  { %466 = vrot.lane.b32.xlu0 %v464_v17, %s916_s1 }
 0x608   :  { %v472_v18 = vpop.permute.xlu1 %471 }
 0x609   :  { %883 = vrcp.f32 %v472_v18 }
 0x60a   :  { %885 = vpow2.f32 %v593_v46 }
 0x613   :  { %v884_v19 = vpop.eup %883 }
 0x614   :  { %v475_v21 = vmul.f32 %v884_v19, %v880_v63  ;;  %v886_v48 = vpop.eup %885 }
 0x615   :  { %v467_v20 = vpop.permute.xlu0 %466  ;;  %v403_v49 = vadd.f32 1.0, %v886_v48 }
 0x616   :  { %v469_v22 = vsub.f32 %v432_v61, %v467_v20 }
 0x617   :  { %887 = vrcp.f32 %v403_v49 }
 0x618   :  { %v476_v23 = vmul.f32 %v475_v21, %v469_v22 }
 0x61a   :  { %499 = vrot.lane.b32.xlu0 %v476_v23, %s917_s22  ;;  %478 = vrot.lane.b32.xlu1 %v476_v23, %s918_s23 }
 0x61e   :  { %485 = vrot.lane.b32.xlu1 %v476_v23, %s919_s24 }
 0x621   :  { %v888_v50 = vpop.eup %887 }
 0x622   :  { %492 = vrot.lane.b32.xlu1 %v476_v23, %s920_s25  ;;  %v541_v52 = vsel %vm540_vm13, %v1026_v47, %v888_v50 }
 0x68c   :  { %v479_v24 = vpop.permute.xlu1 %478  ;;  %v500_v30 = vpop.permute.xlu0 %499 }
 0x68d   :  { %v481_v25 = vsel %vm422_vm6, %v479_v24, 0.0  ;;  %v502_v31 = vsel %vm422_vm6, %v500_v30, 0.0 }
 0x68e   :  { %482 = vadd.xlane.f32.xlu1 %v481_v25 }
 0x690   :  { %v486_v26 = vpop.permute.xlu1 %485 }
 0x691   :  { %v488_v27 = vsel %vm422_vm6, %v486_v26, 0.0 }
 0x692   :  { %489 = vadd.xlane.f32.xlu0 %v488_v27 }
 0x694   :  { %v493_v28 = vpop.permute.xlu1 %492 }
 0x695   :  { %v495_v29 = vsel %vm422_vm6, %v493_v28, 0.0 }
 0x696   :  { %496 = vadd.xlane.f32.xlu0 %v495_v29 }
 0x69a   :  { %503 = vadd.xlane.f32.xlu0 %v502_v31 }
 0x69f   :  { %528 = vrot.lane.b32.xlu1 %v469_v22, %s918_s23 }
 0x71b   :  { %v483_v34 = vpop.xlane.xlu1 %482 }
 0x71c   :  { %v484_v41 = vsub.f32 0.0, %v483_v34 }
 0x71f   :  { %v490_v35 = vpop.xlane.xlu0 %489  ;;  %v529_v36 = vpop.permute.xlu1 %528 }
 0x720   :  { %v531_v37 = vsel %vm526_vm9, %v529_v36, 0.0  ;;  %v491_v39 = vsub.f32 0.0, %v490_v35 }
 0x721   :  { %533 = vrot.lane.b32.xlu0 %v531_v37, %s916_s1 }
 0x722   :  { %v507_v43 = vsel %vm506_vm10, %v484_v41, %v491_v39 }
 0x723   :  { %v497_v38 = vpop.xlane.xlu0 %496 }
 0x724   :  { %v498_v40 = vsub.f32 0.0, %v497_v38 }
 0x726   :  { %v509_v45 = vsel %vm508_vm11, %v507_v43, %v498_v40 }
 0x727   :  { %v504_v42 = vpop.xlane.xlu0 %503 }
 0x728   :  { %v505_v44 = vsub.f32 0.0, %v504_v42 }
 0x72a   :  { %v511_v14 = vsel %vm510_vm12, %v509_v45, %v505_v44 }
 0x72b   :  { %537 = vrot.lane.b32.xlu1 %v511_v14, %s921_s26 }
 0x793   :  { %v534_v51 = vpop.permute.xlu0 %533 }
 0x794   :  { %v542_v53 = vsel %vm422_vm6, %v541_v52, %v534_v51 }
 0x79d   :  { %v538_v54 = vpop.permute.xlu1 %537 }
 0x79e   :  { %v544_v55 = vsel %vm543_vm14, %v542_v53, %v538_v54 }
 0x79f   :  { %v546_v56 = vsel %vm545_vm15, %v544_v55, 0.0 }
 0x7a0   :  { %547 = vst [vmem:[#allocation2] sm:$0xff] %v546_v56 }
 0x7a1   :  { %900 = shalt.err (!%p897_p4)
}
 0x7a2   :  { %s901_s3 = scalar_lea.hbm %s1078_s2, 128 }
 0x7a3   :  { %p902_p5 = scmp.ne.s32.totalorder %s1078_s2, %s901_s3  ;;  %p905_p6 = scmp.lt.u32.totalorder %s901_s3, %s1078_s2 }
 0x7a5   :  { %p907_p7 = pnand %p905_p6, %p902_p5 }
 0x7a7   :  { %910 = shalt.err (!%p907_p7)
}
 0x7a8   :  { %557 = dma.vmem_to_hbm [thread:$0]  %s555_s28, 128, %s1078_s2, [#allocation3]  }
 0x7a9   :  { %911 = dma.done.wait [#allocation3], 128  }
 0x7aa   :  { %912 = vsyncadd [#allocation3], 4294967168 }
 0x7ab   :  { %561 = vsyncpa [#allocation3], 1 }

</bundles_post_ra>
